<compile_context>
chip_gen: v5e
topology: v5e:2x2
jax: 0.10.0
libtpu: 0.0.40
codegen_flags: <defaults>
</compile_context>

<pallas_src>
from functools import lru_cache, partial

import numpy as np
import jax
import jax.numpy as jnp
from jax.experimental import pallas as pl
from jax.experimental.pallas import tpu as pltpu

BASIS_DTYPE = jnp.float32  # f32 keeps the result bit-close to the f64 reference


def extractor_loss_kernel(x_ref, basis_ref, out_ref, *, n_wanted, n_freqs, f_pad):
    # x_ref:     [1, N_pad]        signal row (time on lanes, zero padded)
    # basis_ref: [N_pad, 2*f_pad]  fused [cos | sin] basis, zero-padded cols/rows
    # out_ref:   [1, 1]            scalar loss (= -SNR)
    proj = jnp.dot(
        x_ref[...], basis_ref[...],
        preferred_element_type=jnp.float32,
        precision=jax.lax.Precision.HIGHEST,
    )                                                           # [1, 2*f_pad]
    c = proj[:, :f_pad]                                         # cos projections
    s = proj[:, f_pad:]                                         # sin projections
    psd = c * c + s * s                                         # [1, f_pad]

    # Columns are ordered [wanted | unwanted | pad]; static counts -> iota masks.
    col = jax.lax.broadcasted_iota(jnp.int32, psd.shape, 1)
    zeros = jnp.zeros_like(psd)
    term1 = jnp.sum(jnp.where(col < n_wanted, psd, zeros),
                    axis=1, keepdims=True)                      # [1, 1]
    # NOTE: like the PyTorch original, term2 == 0 (empty unwanted band or a zero
    # signal) yields inf/NaN; no guard is added to keep semantics identical.
    term2 = jnp.sum(jnp.where((col >= n_wanted) & (col < n_freqs), psd, zeros),
                    axis=1, keepdims=True)                      # [1, 1]

    out_ref[...] = -10.0 * jnp.log10(term1 / term2)


@lru_cache(maxsize=None)
def _build_extractor(N, f_true, fs, delta, f_min, f_max):
    """Builds (once per config) the device-resident fused basis + jitted call."""
    # Frequency sets exactly as in the PyTorch module (static python ints).
    f_wanted = list(range(f_true - delta, f_true + delta + 1))
    f_unwanted = (list(range(f_min, f_true - delta)) +
                  list(range(f_true + delta + 1, f_max + 1)))
    all_freqs = f_wanted + f_unwanted                           # [wanted | unwanted]
    n_wanted, F = len(f_wanted), len(all_freqs)
    f_pad = max(128, ((F + 127) // 128) * 128)                  # lane-aligned
    n_pad = max(128, ((N + 127) // 128) * 128)                  # (8,128)-aligned time

    # Fused, transposed basis: one lane-dense operand instead of cos + sin + masks.
    i_idx = np.arange(N, dtype=np.float64)
    f_col = np.asarray(all_freqs, dtype=np.float64)[:, None]    # [F, 1]
    phase = 2.0 * np.pi * f_col * i_idx[None, :] / float(fs)    # [F, N]
    basis_T = np.zeros((n_pad, 2 * f_pad), dtype=np.float32)
    basis_T[:N, :F] = np.cos(phase).T
    basis_T[:N, f_pad:f_pad + F] = np.sin(phase).T
    basis_dev = jnp.asarray(basis_T, dtype=BASIS_DTYPE)         # uploaded once

    call = pl.pallas_call(
        partial(extractor_loss_kernel,
                n_wanted=n_wanted, n_freqs=F, f_pad=f_pad),
        out_shape=jax.ShapeDtypeStruct((1, 1), jnp.float32),
        # No grid: whole arrays live in VMEM; no double-buffering, no pipeline
        # step overhead for a single-shot microsecond-scale kernel.
        in_specs=[pl.BlockSpec(memory_space=pltpu.MemorySpace.VMEM),
                  pl.BlockSpec(memory_space=pltpu.MemorySpace.VMEM)],
        out_specs=pl.BlockSpec(memory_space=pltpu.MemorySpace.VMEM),
    )

    @jax.jit
    def run(x):
        x_row = jnp.pad(x.astype(BASIS_DTYPE), (0, n_pad - N)).reshape(1, n_pad)
        return call(x_row, basis_dev)[0, 0]

    return run


def extractor_loss(x, f_true, fs, delta, f_range):
    """x: 1-D array of length N. Returns scalar loss (== -SNR), same as PyTorch."""
    f_min, f_max = f_range
    run = _build_extractor(int(x.shape[0]), int(f_true), int(fs), int(delta),
                           int(f_min), int(f_max))
    return run(jnp.asarray(x))


def _reference_loss_np(x, f_true, fs, delta, f_range):
    """Pure-numpy reference with identical semantics for correctness check."""
    x = np.asarray(x, dtype=np.float64)
    n = len(x)
    f_min, f_max = f_range

    def psd(f):
        i = np.arange(n)
        t1 = np.sum(x * np.cos(2 * np.pi * f * i / fs))
        t2 = np.sum(x * np.sin(2 * np.pi * f * i / fs))
        return t1 ** 2 + t2 ** 2

    f_wanted = list(range(f_true - delta, f_true + delta + 1))
    f_unwanted = (list(range(f_min, f_true - delta)) +
                  list(range(f_true + delta + 1, f_max + 1)))
    term1 = sum(psd(f) for f in f_wanted)
    term2 = sum(psd(f) for f in f_unwanted)
    return -10.0 * np.log10(term1 / term2)


if __name__ == "__main__":
    # Small, deterministic example: a noisy sinusoid at f_true.
    N = 128        # sequence length (samples)
    fs = 128       # sampling frequency
    f_true = 10    # ground-truth frequency (integer, as the module assumes)
    delta = 2      # wanted band half-width
    f_range = (1, 40)

    key = jax.random.PRNGKey(0)
    t = jnp.arange(N, dtype=jnp.float32)
    signal = jnp.sin(2.0 * jnp.pi * f_true * t / fs)
    noise = 0.3 * jax.random.normal(key, (N,), dtype=jnp.float32)
    x = signal + noise

    loss = extractor_loss(x, f_true, fs, delta, f_range)
    loss = jax.block_until_ready(loss)

    # Second call exercises the cached basis + compiled executable path.
    loss2 = jax.block_until_ready(extractor_loss(x, f_true, fs, delta, f_range))

    ref = _reference_loss_np(np.asarray(x), f_true, fs, delta, f_range)
    assert np.isfinite(float(loss)), float(loss)
    assert np.allclose(float(loss), ref, rtol=2e-2, atol=2e-2), (float(loss), ref)
    assert np.allclose(float(loss2), float(loss)), (float(loss2), float(loss))

    print("KERNEL_OK")
</pallas_src>

<mosaic_0001>
module attributes {stable_mosaic.version = 11 : i64} {
  func.func @extractor_loss_kernel(%arg0: memref<1x128xf32, #tpu.memory_space<vmem>>, %arg1: memref<128x256xf32, #tpu.memory_space<vmem>>, %arg2: memref<1x1xf32, #tpu.memory_space<vmem>>) attributes {dimension_semantics = [], scalar_prefetch = 0 : i64, scratch_operands = 0 : i64, tpu.core_type = #tpu.core_type<tc>} {
    %c0 = arith.constant 0 : index
    %c0_0 = arith.constant 0 : index
    %0 = vector.load %arg0[%c0, %c0_0] : memref<1x128xf32, #tpu.memory_space<vmem>>, vector<1x128xf32>
    %c0_1 = arith.constant 0 : index
    %c0_2 = arith.constant 0 : index
    %1 = vector.load %arg1[%c0_1, %c0_2] : memref<128x256xf32, #tpu.memory_space<vmem>>, vector<128x256xf32>
    %cst = arith.constant dense<0.000000e+00> : vector<1x256xf32>
    %2 = tpu.matmul %0, %1, %cst {dimension_numbers = #tpu.dot_dimension_numbers<[1], [0], [0], [1], [0, 0, 1, 1], [], []>, precision = #tpu.contract_precision<fp32>} : vector<1x128xf32>, vector<128x256xf32>, vector<1x256xf32> -> vector<1x256xf32>
    %3 = vector.extract_strided_slice %2 {offsets = [0, 0], sizes = [1, 128], strides = [1, 1]} : vector<1x256xf32> to vector<1x128xf32>
    %4 = vector.extract_strided_slice %2 {offsets = [0, 128], sizes = [1, 128], strides = [1, 1]} : vector<1x256xf32> to vector<1x128xf32>
    %5 = arith.mulf %3, %3 : vector<1x128xf32>
    %6 = arith.mulf %4, %4 : vector<1x128xf32>
    %7 = arith.addf %5, %6 : vector<1x128xf32>
    %8 = tpu.iota {dimensions = array<i32: 1>} : vector<1x128xi32>
    %cst_3 = arith.constant 0.000000e+00 : f32
    %9 = vector.broadcast %cst_3 : f32 to vector<1x128xf32>
    %c5_i32 = arith.constant 5 : i32
    %10 = vector.broadcast %c5_i32 : i32 to vector<1x128xi32>
    %11 = arith.cmpi slt, %8, %10 : vector<1x128xi32>
    %12 = arith.select %11, %7, %9 : vector<1x128xi1>, vector<1x128xf32>
    %cst_4 = arith.constant dense<0.000000e+00> : vector<1xf32>
    %13 = vector.multi_reduction <add>, %12, %cst_4 [1] : vector<1x128xf32> to vector<1xf32>
    %14 = vector.shape_cast %13 : vector<1xf32> to vector<1x1xf32>
    %c5_i32_5 = arith.constant 5 : i32
    %15 = vector.broadcast %c5_i32_5 : i32 to vector<1x128xi32>
    %16 = arith.cmpi sge, %8, %15 : vector<1x128xi32>
    %c40_i32 = arith.constant 40 : i32
    %17 = vector.broadcast %c40_i32 : i32 to vector<1x128xi32>
    %18 = arith.cmpi slt, %8, %17 : vector<1x128xi32>
    %19 = arith.andi %16, %18 : vector<1x128xi1>
    %20 = arith.select %19, %7, %9 : vector<1x128xi1>, vector<1x128xf32>
    %cst_6 = arith.constant dense<0.000000e+00> : vector<1xf32>
    %21 = vector.multi_reduction <add>, %20, %cst_6 [1] : vector<1x128xf32> to vector<1xf32>
    %22 = vector.shape_cast %21 : vector<1xf32> to vector<1x1xf32>
    %23 = arith.divf %14, %22 : vector<1x1xf32>
    %24 = math.log %23 : vector<1x1xf32>
    %cst_7 = arith.constant 0.434294492 : f32
    %25 = vector.broadcast %cst_7 : f32 to vector<1x1xf32>
    %26 = arith.mulf %24, %25 : vector<1x1xf32>
    %cst_8 = arith.constant -1.000000e+01 : f32
    %27 = vector.broadcast %cst_8 : f32 to vector<1x1xf32>
    %28 = arith.mulf %27, %26 : vector<1x1xf32>
    %c0_9 = arith.constant 0 : index
    %c0_10 = arith.constant 0 : index
    %29 = vector.load %arg2[%c0_9, %c0_10] : memref<1x1xf32, #tpu.memory_space<vmem>>, vector<1x1xf32>
    tpu.vector_store %arg2[%c0_9, %c0_10], %28 {strides = array<i32>} : memref<1x1xf32, #tpu.memory_space<vmem>>, vector<1x1xf32>,
    return
  }
}

</mosaic_0001>

<bundles_post_ra>
// kernel: run.1
= control target key start
LH: loop header
LB: loop body
LE: loop exit
PB: predicated region body
PF: predicated region fallthrough
CT: control target
= control target key end

     0   :  { %7 = vsyncpa [#allocation3], 0  ;;  %s1430_s0 = inlined_call_operand.hbm [shape: f32[1,128], index: 0, kind: input, shape index: {}]   ;;  %s1431_s1 = inlined_call_operand.hbm [shape: f32[128,256], index: 1, kind: input, shape index: {}]   ;;  %s1432_s2 = inlined_call_operand.hbm [shape: f32[1,1], index: 2, kind: output, shape index: {}]  }
   0x1   :  { %8 = vsyncpa [#allocation6], 0 }
   0x2   :  { %9 = vsyncpa [#allocation4], 0  ;;  %s15_s11 = sshll.u32 %s1430_s0, 4  ;;  %s901_s12 = smov [#allocation2]   ;;  %s16_s11 = int_to_ptr.hbm [resolvable:$true] %s15_s11 }
   0x3   :  { %s17_s13 = sshll.u32 %s901_s12, 4  ;;  %s25_s16 = sshll.u32 %s1431_s1, 4  ;;  %s18_s13 = int_to_ptr.vmem [resolvable:$true] %s17_s13  ;;  %s26_s16 = int_to_ptr.hbm [resolvable:$true] %s25_s16 }
   0x4   :  { %20 = dma.hbm_to_vmem [thread:$0]  %s16_s11, 16, %s18_s13, [#allocation3]  }
   0x5   :  { %s902_s17 = smov [#allocation5]   ;;  %s903_s19 = smov 256  }
   0x6   :  { %s27_s18 = sshll.u32 %s902_s17, 4  ;;  %s904_s20 = smov 16   ;;  %s28_s18 = int_to_ptr.vmem [resolvable:$true] %s27_s18 }
   0x7   :  { %33 = dma.hbm_to_vmem [thread:$0]  %s26_s16, 4096, %s28_s18, [#allocation6], %s903_s19, %s903_s19, %s904_s20  }
   0x8   :  { %895 = dma.done.wait [#allocation3], 16  }
   0x9   :  { %896 = vsyncadd [#allocation3], 4294967280 }
   0xa   :  { %897 = dma.done.wait [#allocation6], 4096  }
   0xb   :  { %898 = vsyncadd [#allocation6], 4294963200  ;;  %v73_v0 = vld [vmem:[#allocation5 + $0xf0] sm:$0xff]  ;;  %v71_v1 = vld [vmem:[#allocation5 + $0xe0] sm:$0xff]  ;;  %vm764_vm3 = vcmask 1040384   ;;  %s905_s0 = smov [#allocation7]  }
   0xc   :  { %v69_v2 = vld [vmem:[#allocation5 + $0xd0] sm:$0xff]  ;;  %v927_v3 = vand.u32 4294901760, %v73_v0  ;;  %v929_v4 = vand.u32 4294901760, %v71_v1  ;;  %v67_v6 = vld [vmem:[#allocation5 + $0xc0] sm:$0xff]  ;;  %v74_v55 = vld [vmem:[#allocation5 + $0xf8] sm:$0xff]  ;;  %s801_s1 = sshll.u32 %s905_s0, 4  ;;  %s802_s1 = int_to_ptr.vmem [resolvable:$true] %s801_s1 }
   0xd   :  { %v931_v5 = vand.u32 4294901760, %v69_v2  ;;  %v65_v7 = vld [vmem:[#allocation5 + $0xb0] sm:$0xff]  ;;  %v63_v8 = vld [vmem:[#allocation5 + $0xa0] sm:$0xff]  ;;  %v933_v9 = vand.u32 4294901760, %v67_v6  ;;  %v72_v63 = vld [vmem:[#allocation5 + $0xe8] sm:$0xff]  ;;  %s803_s23 = sshll.u32 %s1432_s2, 4  ;;  %s804_s23 = int_to_ptr.hbm [resolvable:$true] %s803_s23 }
   0xe   :  { %v935_v10 = vand.u32 4294901760, %v65_v7  ;;  %v937_v11 = vand.u32 4294901760, %v63_v8  ;;  %v61_v12 = vld [vmem:[#allocation5 + $0x90] sm:$0xff]  ;;  %v59_v13 = vld [vmem:[#allocation5 + $0x80] sm:$0xff]  ;;  %76 = vmatpush.msra.mxu0 %v927_v3  ;;  %v941_v14 = vsub.f32 %v73_v0, %v927_v3  ;;  %v944_v15 = vsub.f32 %v71_v1, %v929_v4  ;;  %272 = vmatpush.msra.mxu3 %v927_v3 }
   0xf   :  { %v948_v16 = vsub.f32 %v69_v2, %v931_v5  ;;  %v950_v17 = vand.u32 4294901760, %v61_v12  ;;  %v953_v18 = vsub.f32 %v67_v6, %v933_v9  ;;  %v57_v21 = vld [vmem:[#allocation5 + $0x70] sm:$0xff]  ;;  %v966_v25 = vand.u32 4294901760, %v59_v13  ;;  %v55_v34 = vld [vmem:[#allocation5 + $0x60] sm:$0xff] }
  0x10   :  { %v956_v19 = vsub.f32 %v65_v7, %v935_v10  ;;  %v959_v20 = vsub.f32 %v63_v8, %v937_v11  ;;  %219 = vmatpush.msra.mxu2 %v941_v14  ;;  %78 = vmatpush.msra.mxu0 %v929_v4  ;;  %v1447_v22 = vand.u32 4294901760, %v941_v14  ;;  %v1446_v23 = vand.u32 4294901760, %v944_v15  ;;  %v53_v35 = vld [vmem:[#allocation5 + $0x50] sm:$0xff]  ;;  %v51_v40 = vld [vmem:[#allocation5 + $0x40] sm:$0xff] }
  0x11   :  { %v1445_v24 = vand.u32 4294901760, %v948_v16  ;;  %274 = vmatpush.msra.mxu3 %v929_v4  ;;  %v1442_v26 = vand.u32 4294901760, %v953_v18  ;;  %v972_v28 = vsub.f32 %v61_v12, %v950_v17  ;;  %v985_v32 = vand.u32 4294901760, %v57_v21  ;;  %v49_v48 = vld [vmem:[#allocation5 + $0x30] sm:$0xff]  ;;  %v47_v53 = vld [vmem:[#allocation5 + $0x20] sm:$0xff] }
  0x12   :  { %v1441_v27 = vand.u32 4294901760, %v956_v19  ;;  %222 = vmatpush.msra.mxu2 %v944_v15  ;;  %80 = vmatpush.msra.mxu0 %v931_v5  ;;  %v119_v29 = vsub.f32 %v941_v14, %v1447_v22  ;;  %v125_v30 = vsub.f32 %v944_v15, %v1446_v23  ;;  %v1439_v33 = vand.u32 4294901760, %v959_v20  ;;  %v45_v60 = vld [vmem:[#allocation5 + $0x10] sm:$0xff]  ;;  %v43_v6 = vld [vmem:[#allocation5] sm:$0xff] }
  0x13   :  { %v131_v31 = vsub.f32 %v948_v16, %v1445_v24  ;;  %276 = vmatpush.msra.mxu3 %v931_v5  ;;  %v137_v38 = vsub.f32 %v953_v18, %v1442_v26  ;;  %v995_v39 = vsub.f32 %v59_v13, %v966_v25  ;;  %v1002_v42 = vsub.f32 %v57_v21, %v985_v32  ;;  %v70_v13 = vld [vmem:[#allocation5 + $0xd8] sm:$0xff] }
  0x14   :  { %v120_v36 = vand.u32 4294901760, %v119_v29  ;;  %225 = vmatpush.msra.mxu2 %v948_v16  ;;  %82 = vmatpush.msra.mxu0 %v933_v9  ;;  %v126_v37 = vand.u32 4294901760, %v125_v30  ;;  %v143_v41 = vsub.f32 %v956_v19, %v1441_v27  ;;  %v1438_v44 = vand.u32 4294901760, %v972_v28 }
  0x15   :  { %278 = vmatpush.msra.mxu3 %v933_v9  ;;  %v132_v43 = vand.u32 4294901760, %v131_v31  ;;  %v1006_v45 = vand.u32 4294901760, %v55_v34  ;;  %v1008_v46 = vand.u32 4294901760, %v53_v35  ;;  %v1012_v47 = vand.u32 4294901760, %v51_v40 }
  0x16   :  { %121 = vmatpush.msra.mxu1 %v120_v36  ;;  %228 = vmatpush.msra.mxu2 %v953_v18  ;;  %v138_v49 = vand.u32 4294901760, %v137_v38  ;;  %v149_v50 = vsub.f32 %v959_v20, %v1439_v33  ;;  %v1437_v51 = vand.u32 4294901760, %v995_v39  ;;  %v1435_v54 = vand.u32 4294901760, %v1002_v42  ;;  %v60_v33 = vld [vmem:[#allocation5 + $0x88] sm:$0xff] }
  0x17   :  { %84 = vmatpush.msra.mxu0 %v935_v10  ;;  %280 = vmatpush.msra.mxu3 %v935_v10  ;;  %v1020_v52 = vsub.f32 %v55_v34, %v1006_v45  ;;  %v144_v56 = vand.u32 4294901760, %v143_v41  ;;  %v155_v57 = vsub.f32 %v972_v28, %v1438_v44  ;;  %v1030_v58 = vsub.f32 %v53_v35, %v1008_v46 }
  0x18   :  { %127 = vmatpush.msra.mxu1 %v126_v37  ;;  %231 = vmatpush.msra.mxu2 %v956_v19  ;;  %v1032_v59 = vand.u32 4294901760, %v49_v48  ;;  %v1037_v61 = vsub.f32 %v51_v40, %v1012_v47  ;;  %v1039_v62 = vand.u32 4294901760, %v47_v53  ;;  %v150_v0 = vand.u32 4294901760, %v149_v50  ;;  %v68_v37 = vld [vmem:[#allocation5 + $0xc8] sm:$0xff]  ;;  %v66_v50 = vld [vmem:[#allocation5 + $0xb8] sm:$0xff] }
  0x19   :  { %86 = vmatpush.msra.mxu0 %v937_v11  ;;  %282 = vmatpush.msra.mxu3 %v937_v11  ;;  %v161_v1 = vsub.f32 %v995_v39, %v1437_v51  ;;  %v1434_v2 = vand.u32 4294901760, %v1020_v52  ;;  %v1046_v7 = vand.u32 4294901760, %v74_v55  ;;  %v167_v8 = vsub.f32 %v1002_v42, %v1435_v54  ;;  %v62_v54 = vld [vmem:[#allocation5 + $0x98] sm:$0xff] }
  0x1a   :  { %133 = vmatpush.msra.mxu1 %v132_v43  ;;  %234 = vmatpush.msra.mxu2 %v959_v20  ;;  %v1053_v12 = vand.u32 4294901760, %v45_v60  ;;  %v156_v21 = vand.u32 4294901760, %v155_v57  ;;  %v1433_v29 = vand.u32 4294901760, %v1030_v58  ;;  %v1058_v30 = vsub.f32 %v49_v48, %v1032_v59 }
  0x1b   :  { %88 = vmatpush.msra.mxu0 %v950_v17  ;;  %284 = vmatpush.msra.mxu3 %v950_v17  ;;  %v1060_v31 = vand.u32 4294901760, %v72_v63  ;;  %v1436_v34 = vand.u32 4294901760, %v1037_v61  ;;  %v1066_v35 = vsub.f32 %v47_v53, %v1039_v62  ;;  %v1068_v36 = vand.u32 4294901760, %v43_v6 }
  0x1c   :  { %139 = vmatpush.msra.mxu1 %v138_v49  ;;  %237 = vmatpush.msra.mxu2 %v972_v28  ;;  %1461 = vst [vmem:[#allocation11_spill] sm:$0xff] %v1053_v12  ;;  %v162_v38 = vand.u32 4294901760, %v161_v1  ;;  %v173_v40 = vsub.f32 %v1020_v52, %v1434_v2  ;;  %v1075_v41 = vsub.f32 %v74_v55, %v1046_v7  ;;  %v1077_v43 = vand.u32 4294901760, %v70_v13 }
  0x1d   :  { %90 = vmatpush.msra.mxu0 %v966_v25  ;;  %286 = vmatpush.msra.mxu3 %v966_v25  ;;  %1462 = vst [vmem:[#allocation12_spill] sm:$0xff] %v1068_v36  ;;  %v168_v48 = vand.u32 4294901760, %v167_v8  ;;  %v1082_v49 = vsub.f32 %v45_v60, %v1053_v12  ;;  %v179_v53 = vsub.f32 %v1030_v58, %v1433_v29  ;;  %v1440_v55 = vand.u32 4294901760, %v1058_v30 }
  0x1e   :  { %145 = vmatpush.msra.mxu1 %v144_v56  ;;  %240 = vmatpush.msra.mxu2 %v995_v39  ;;  %v1090_v56 = vsub.f32 %v72_v63, %v1060_v31  ;;  %v1092_v57 = vand.u32 4294901760, %v68_v37  ;;  %v185_v60 = vsub.f32 %v1037_v61, %v1436_v34  ;;  %v1443_v1 = vand.u32 4294901760, %v1066_v35 }
  0x1f   :  { %92 = vmatpush.msra.mxu0 %v985_v32  ;;  %288 = vmatpush.msra.mxu3 %v985_v32  ;;  %v1101_v8 = vsub.f32 %v43_v6, %v1068_v36  ;;  %v174_v63 = vand.u32 4294901760, %v173_v40  ;;  %v1106_v29 = vsub.f32 %v70_v13, %v1077_v43  ;;  %v1108_v2 = vand.u32 4294901760, %v66_v50 }
  0x20   :  { %151 = vmatpush.msra.mxu1 %v150_v0  ;;  %243 = vmatpush.msra.mxu2 %v1002_v42  ;;  %1463 = vst [vmem:[#allocation13_spill] sm:$0xff] %v1090_v56  ;;  %v64_v0 = vld [vmem:[#allocation5 + $0xa8] sm:$0xff]  ;;  %v1449_v34 = vand.u32 4294901760, %v1082_v49  ;;  %v191_v13 = vsub.f32 %v1058_v30, %v1440_v55  ;;  %v1448_v40 = vand.u32 4294901760, %v1090_v56  ;;  %v1121_v51 = vsub.f32 %v68_v37, %v1092_v57 }
  0x21   :  { %94 = vmatpush.msra.mxu0 %v1006_v45  ;;  %290 = vmatpush.msra.mxu3 %v1006_v45  ;;  %1464 = vst [vmem:[#allocation14_spill] sm:$0xff] %v1106_v29  ;;  %v1113_v6 = vand.u32 4294901760, %v64_v0  ;;  %v1452_v44 = vand.u32 4294901760, %v1101_v8  ;;  %v186_v55 = vand.u32 4294901760, %v185_v60  ;;  %v1453_v27 = vand.u32 4294901760, %v1106_v29  ;;  %v58_v60 = vld [vmem:[#allocation5 + $0x78] sm:$0xff] }
  0x22   :  { %157 = vmatpush.msra.mxu1 %v156_v21  ;;  %246 = vmatpush.msra.mxu2 %v1020_v52  ;;  %v1444_v21 = vand.u32 4294901760, %v1075_v41  ;;  %1465 = vst [vmem:[#allocation15_spill] sm:$0xff] %v1121_v51  ;;  %v1137_v26 = vsub.f32 %v66_v50, %v1108_v2  ;;  %v466_v50 = vsub.f32 %v1090_v56, %v1448_v40  ;;  %v1152_v23 = vand.u32 4294901760, %v60_v33 }
  0x23   :  { %96 = vmatpush.msra.mxu0 %v1008_v46  ;;  %292 = vmatpush.msra.mxu3 %v1008_v46  ;;  %v1167_v24 = vand.u32 4294901760, %v58_v60  ;;  %vm794_vm9 = vcmask 0  }
  0x24   :  { %163 = vmatpush.msra.mxu1 %v162_v38  ;;  %249 = vmatpush.msra.mxu2 %v1030_v58  ;;  %v180_v38 = vand.u32 4294901760, %v179_v53  ;;  %v1129_v53 = vand.u32 4294901760, %v62_v54  ;;  %v460_v37 = vsub.f32 %v1075_v41, %v1444_v21  ;;  %v192_v21 = vand.u32 4294901760, %v191_v13  ;;  %v56_v13 = vld [vmem:[#allocation5 + $0x68] sm:$0xff] }
  0x25   :  { %98 = vmatpush.msra.mxu0 %v1012_v47  ;;  %294 = vmatpush.msra.mxu3 %v1012_v47 }
  0x26   :  { %169 = vmatpush.msra.mxu1 %v168_v48  ;;  %252 = vmatpush.msra.mxu2 %v1037_v61  ;;  %v197_v48 = vsub.f32 %v1066_v35, %v1443_v1  ;;  %v1145_v1 = vsub.f32 %v64_v0, %v1113_v6  ;;  %v209_v0 = vsub.f32 %v1101_v8, %v1452_v44  ;;  %v461_v40 = vand.u32 4294901760, %v460_v37  ;;  %v54_v44 = vld [vmem:[#allocation5 + $0x58] sm:$0xff] }
  0x27   :  { %100 = vmatpush.msra.mxu0 %v1032_v59  ;;  %296 = vmatpush.msra.mxu3 %v1032_v59  ;;  %v1466_v37 = vand.u32 4294901760, %v1121_v51 }
  0x28   :  { %175 = vmatpush.msra.mxu1 %v174_v63  ;;  %255 = vmatpush.msra.mxu2 %v1058_v30  ;;  %v203_v63 = vsub.f32 %v1082_v49, %v1449_v34  ;;  %v198_v22 = vand.u32 4294901760, %v197_v48  ;;  %v472_v34 = vsub.f32 %v1106_v29, %v1453_v27  ;;  %v1177_v48 = vsub.f32 %v60_v33, %v1152_v23 }
  0x29   :  { %102 = vmatpush.msra.mxu0 %v1039_v62  ;;  %298 = vmatpush.msra.mxu3 %v1039_v62  ;;  %v478_v27 = vsub.f32 %v1121_v51, %v1466_v37  ;;  %v1179_v29 = vand.u32 4294901760, %v56_v13  ;;  %v1189_v33 = vsub.f32 %v58_v60, %v1167_v24  ;;  %v1191_v51 = vand.u32 4294901760, %v54_v44 }
  0x2a   :  { %181 = vmatpush.msra.mxu1 %v180_v38  ;;  %258 = vmatpush.msra.mxu2 %v1066_v35  ;;  %v1160_v38 = vsub.f32 %v62_v54, %v1129_v53  ;;  %v204_v56 = vand.u32 4294901760, %v203_v63  ;;  %v1467_v63 = vand.u32 4294901760, %v941_v14  ;;  %v210_v54 = vand.u32 4294901760, %v209_v0 }
  0x2b   :  { %104 = vmatpush.msra.mxu0 %v1053_v12  ;;  %300 = vmatpush.msra.mxu3 %v1053_v12  ;;  %v1468_v12 = vand.u32 4294901760, %v1137_v26  ;;  %v1469_v14 = vand.u32 4294901760, %v944_v15  ;;  %v1470_v0 = vand.u32 4294901760, %v1145_v1  ;;  %v1201_v60 = vsub.f32 %v56_v13, %v1179_v29 }
  0x2c   :  { %187 = vmatpush.msra.mxu1 %v186_v55  ;;  %261 = vmatpush.msra.mxu2 %v1082_v49  ;;  %v467_v55 = vand.u32 4294901760, %v466_v50  ;;  %v473_v50 = vand.u32 4294901760, %v472_v34  ;;  %v479_v34 = vand.u32 4294901760, %v478_v27  ;;  %v1471_v15 = vand.u32 4294901760, %v948_v16 }
  0x2d   :  { %106 = vmatpush.msra.mxu0 %v1068_v36  ;;  %302 = vmatpush.msra.mxu3 %v1068_v36  ;;  %v52_v36 = vld [vmem:[#allocation5 + $0x48] sm:$0xff]  ;;  %v484_v37 = vsub.f32 %v1137_v26, %v1468_v12  ;;  %v1213_v13 = vsub.f32 %v54_v44, %v1191_v51  ;;  %v1472_v16 = vand.u32 4294901760, %v953_v18  ;;  %v46_v12 = vld [vmem:[#allocation5 + $0x18] sm:$0xff] }
  0x2e   :  { %193 = vmatpush.msra.mxu1 %v192_v21  ;;  %264 = vmatpush.msra.mxu2 %v1101_v8  ;;  %v1460_v21 = vand.u32 4294901760, %v1160_v38 }
  0x2f   :  { %313 = vmatpush.msrb.mxu0 %v1467_v63  ;;  %462 = vmatpush.msrb.mxu3 %v461_v40  ;;  %v50_v40 = vld [vmem:[#allocation5 + $0x38] sm:$0xff]  ;;  %v1203_v63 = vand.u32 4294901760, %v52_v36  ;;  %v485_v27 = vand.u32 4294901760, %v484_v37  ;;  %v513_v37 = vand.u32 4294901760, %v1201_v60 }
  0x30   :  { %417 = vmatpush.msrb.mxu2 %v1046_v7  ;;  %199 = vmatpush.msra.mxu1 %v198_v22  ;;  %v490_v22 = vsub.f32 %v1145_v1, %v1470_v0  ;;  %v48_v0 = vld [vmem:[#allocation5 + $0x28] sm:$0xff] }
  0x31   :  { %317 = vmatpush.msrb.mxu0 %v1469_v14  ;;  %468 = vmatpush.msrb.mxu3 %v467_v55  ;;  %v496_v14 = vsub.f32 %v1160_v38, %v1460_v21  ;;  %v1215_v55 = vand.u32 4294901760, %v50_v40  ;;  %v1226_v44 = vsub.f32 %v52_v36, %v1203_v63  ;;  %v1228_v21 = vand.u32 4294901760, %v48_v0 }
  0x32   :  { %419 = vmatpush.msrb.mxu2 %v1060_v31  ;;  %205 = vmatpush.msra.mxu1 %v204_v56  ;;  %v507_v56 = vand.u32 4294901760, %v1189_v33 }
  0x33   :  { %321 = vmatpush.msrb.mxu0 %v1471_v15  ;;  %474 = vmatpush.msrb.mxu3 %v473_v50  ;;  %v491_v15 = vand.u32 4294901760, %v490_v22  ;;  %v497_v18 = vand.u32 4294901760, %v496_v14  ;;  %v1239_v36 = vsub.f32 %v50_v40, %v1215_v55  ;;  %v514_v14 = vsub.f32 %v1201_v60, %v513_v37 }
  0x34   :  { %421 = vmatpush.msrb.mxu2 %v1077_v43  ;;  %211 = vmatpush.msra.mxu1 %v210_v54  ;;  %v1473_v54 = vand.u32 4294901760, %v1177_v48  ;;  %v508_v22 = vsub.f32 %v1189_v33, %v507_v56  ;;  %v1252_v40 = vsub.f32 %v48_v0, %v1228_v21 }
  0x35   :  { %325 = vmatpush.msrb.mxu0 %v1472_v16  ;;  %480 = vmatpush.msrb.mxu3 %v479_v34  ;;  %v519_v34 = vand.u32 4294901760, %v1213_v13  ;;  %v1241_v16 = vand.u32 4294901760, %v46_v12 }
  0x36   :  { %380 = vmatpush.msrb.mxu1 %v927_v3  ;;  %423 = vmatpush.msrb.mxu2 %v1092_v57  ;;  %v502_v50 = vsub.f32 %v1177_v48, %v1473_v54  ;;  %v1474_v3 = vand.u32 4294901760, %v956_v19  ;;  %v42_v54 = vld [vmem:[#allocation2] sm:$0x1] }
  0x37   :  { %486 = vmatpush.msrb.mxu3 %v485_v27  ;;  %v525_v27 = vand.u32 4294901760, %v1226_v44  ;;  %v1265_v0 = vsub.f32 %v46_v12, %v1241_v16  ;;  %v1478_v12 = vand.u32 4294901760, %v1002_v42 }
  0x38   :  { %382 = vmatpush.msrb.mxu1 %v929_v4  ;;  %329 = vmatpush.msrb.mxu0 %v1474_v3  ;;  %v1475_v4 = vand.u32 4294901760, %v959_v20  ;;  %v503_v19 = vand.u32 4294901760, %v502_v50  ;;  %v1257_v20 = vand.u32 4294901760, %v42_v54  ;;  %v44_v3 = vld [vmem:[#allocation5 + $0x8] sm:$0xff]  ;;  %v520_v50 = vsub.f32 %v1213_v13, %v519_v34 }
  0x39   :  { %425 = vmatpush.msrb.mxu2 %v1108_v2  ;;  %492 = vmatpush.msrb.mxu3 %v491_v15  ;;  %v509_v15 = vand.u32 4294901760, %v508_v22  ;;  %v537_v22 = vand.u32 4294901760, %v1252_v40 }
  0x3a   :  { %384 = vmatpush.msrb.mxu1 %v931_v5  ;;  %333 = vmatpush.msrb.mxu0 %v1475_v4  ;;  %v1476_v5 = vand.u32 4294901760, %v972_v28  ;;  %v531_v4 = vand.u32 4294901760, %v1239_v36  ;;  %v515_v28 = vand.u32 4294901760, %v514_v14  ;;  %v543_v14 = vand.u32 4294901760, %v1265_v0 }
  0x3b   :  { %427 = vmatpush.msrb.mxu2 %v1113_v6  ;;  %498 = vmatpush.msrb.mxu3 %v497_v18  ;;  %v526_v18 = vsub.f32 %v1226_v44, %v525_v27 }
  0x3c   :  { %386 = vmatpush.msrb.mxu1 %v933_v9  ;;  %337 = vmatpush.msrb.mxu0 %v1476_v5  ;;  %v1477_v9 = vand.u32 4294901760, %v995_v39  ;;  %v1275_v5 = vand.u32 4294901760, %v44_v3  ;;  %v521_v39 = vand.u32 4294901760, %v520_v50  ;;  %v1480_v50 = vand.u32 4294901760, %v1030_v58 }
  0x3d   :  { %429 = vmatpush.msrb.mxu2 %v1129_v53  ;;  %504 = vmatpush.msrb.mxu3 %v503_v19  ;;  %v532_v19 = vsub.f32 %v1239_v36, %v531_v4  ;;  %v527_v42 = vand.u32 4294901760, %v526_v18 }
  0x3e   :  { %388 = vmatpush.msrb.mxu1 %v935_v10  ;;  %341 = vmatpush.msrb.mxu0 %v1477_v9  ;;  %v1281_v10 = vsub.f32 %v42_v54, %v1257_v20  ;;  %v538_v54 = vsub.f32 %v1252_v40, %v537_v22  ;;  %v544_v9 = vsub.f32 %v1265_v0, %v543_v14 }
  0x3f   :  { %431 = vmatpush.msrb.mxu2 %v1152_v23  ;;  %510 = vmatpush.msrb.mxu3 %v509_v15  ;;  %v1296_v15 = vsub.f32 %v44_v3, %v1275_v5  ;;  %v1481_v3 = vand.u32 4294901760, %v1037_v61  ;;  %v1483_v61 = vand.u32 4294901760, %v1066_v35 }
  0x40   :  { %390 = vmatpush.msrb.mxu1 %v937_v11  ;;  %345 = vmatpush.msrb.mxu0 %v1478_v12  ;;  %v1479_v11 = vand.u32 4294901760, %v1020_v52  ;;  %v533_v52 = vand.u32 4294901760, %v532_v19  ;;  %v1493_v19 = vld [vmem:[#allocation15_spill] sm:$0xff] }
  0x41   :  { %433 = vmatpush.msrb.mxu2 %v1167_v24  ;;  %516 = vmatpush.msrb.mxu3 %v515_v28  ;;  %v549_v58 = vand.u32 4294901760, %v1296_v15  ;;  %v1482_v28 = vand.u32 4294901760, %v1058_v30  ;;  %v1484_v30 = vand.u32 4294901760, %v1082_v49  ;;  %v1487_v49 = vld [vmem:[#allocation11_spill] sm:$0xff] }
  0x42   :  { %392 = vmatpush.msrb.mxu1 %v950_v17  ;;  %349 = vmatpush.msrb.mxu0 %v1479_v11  ;;  %v1302_v17 = vand.u32 4294901760, %v1281_v10  ;;  %v1494_v11 = vand.u32 4294901760, %v1493_v19 }
  0x43   :  { %435 = vmatpush.msrb.mxu2 %v1179_v29  ;;  %522 = vmatpush.msrb.mxu3 %v521_v39  ;;  %v1491_v39 = vld [vmem:[#allocation14_spill] sm:$0xff] }
  0x44   :  { %394 = vmatpush.msrb.mxu1 %v966_v25  ;;  %353 = vmatpush.msrb.mxu0 %v1480_v50  ;;  %v539_v25 = vand.u32 4294901760, %v538_v54  ;;  %v110_v18 = vsub.f32 %v1281_v10, %v1302_v17 }
  0x45   :  { %437 = vmatpush.msrb.mxu2 %v1191_v51  ;;  %528 = vmatpush.msrb.mxu3 %v527_v42 }
  0x46   :  { %396 = vmatpush.msrb.mxu1 %v985_v32  ;;  %357 = vmatpush.msrb.mxu0 %v1481_v3  ;;  %v545_v32 = vand.u32 4294901760, %v544_v9  ;;  %v111_v12 = vand.u32 4294901760, %v110_v18 }
  0x47   :  { %439 = vmatpush.msrb.mxu2 %v1203_v63  ;;  %534 = vmatpush.msrb.mxu3 %v533_v52 }
  0x48   :  { %398 = vmatpush.msrb.mxu1 %v1006_v45  ;;  %361 = vmatpush.msrb.mxu0 %v1482_v28  ;;  %v550_v45 = vsub.f32 %v1296_v15, %v549_v58 }
  0x49   :  { %441 = vmatpush.msrb.mxu2 %v1215_v55  ;;  %540 = vmatpush.msrb.mxu3 %v539_v25 }
  0x4a   :  { %400 = vmatpush.msrb.mxu1 %v1008_v46  ;;  %365 = vmatpush.msrb.mxu0 %v1483_v61  ;;  %v1485_v46 = vand.u32 4294901760, %v1101_v8  ;;  %v551_v35 = vand.u32 4294901760, %v550_v45 }
  0x4b   :  { %443 = vmatpush.msrb.mxu2 %v1228_v21  ;;  %546 = vmatpush.msrb.mxu3 %v545_v32 }
  0x4c   :  { %402 = vmatpush.msrb.mxu1 %v1012_v47  ;;  %369 = vmatpush.msrb.mxu0 %v1484_v30  ;;  %v1486_v47 = vand.u32 4294901760, %v1075_v41 }
  0x4d   :  { %445 = vmatpush.msrb.mxu2 %v1241_v16  ;;  %112 = vmatmul.f32.vlgmr.msra.gmra.mxu0 %v111_v12 }
  0x4e   :  { %404 = vmatpush.msrb.mxu1 %v1032_v59  ;;  %267 = vmatmul.f32.vlgmr.msra.gmra.mxu2 %v1281_v10  ;;  %v1488_v59 = vld [vmem:[#allocation13_spill] sm:$0xff] }
  0x4f   :  { %373 = vmatpush.msrb.mxu0 %v1485_v46  ;;  %447 = vmatpush.msrb.mxu2 %v1275_v5  ;;  %v1489_v8 = vand.u32 4294901760, %v1488_v59 }
  0x50   :  { %406 = vmatpush.msrb.mxu1 %v1039_v62  ;;  %306 = vmatmul.f32.vlgmr.msra.gmra.mxu3 %v1302_v17  ;;  %v1490_v62 = vld [vmem:[#allocation12_spill] sm:$0xff] }
  0x51   :  { %560 = vmatpush.msra.mxu0 %v1075_v41  ;;  %654 = vmatpush.msra.mxu2 %v1486_v47  ;;  %v1492_v41 = vand.u32 4294901760, %v1491_v39 }
  0x52   :  { %408 = vmatpush.msrb.mxu1 %v1487_v49  ;;  %552 = vmatpush.msrb.mxu3 %v551_v35 }
  0x53   :  { %213 = vmatmul.f32.vlgmr.msra.gmra.mxu1 %v1257_v20  ;;  %563 = vmatpush.msra.mxu0 %v1488_v59 }
  0x54   :  { %658 = vmatpush.msra.mxu2 %v1489_v8  ;;  %721 = vmatpush.msra.mxu3 %v1046_v7 }
  0x55   :  { %410 = vmatpush.msrb.mxu1 %v1490_v62  ;;  %566 = vmatpush.msra.mxu0 %v1491_v39 }
  0x56   :  { %662 = vmatpush.msra.mxu2 %v1492_v41  ;;  %723 = vmatpush.msra.mxu3 %v1060_v31 }
  0x57   :  { %613 = vmatpush.msra.mxu1 %v1046_v7  ;;  %569 = vmatpush.msra.mxu0 %v1493_v19  ;;  %v1495_v7 = vand.u32 4294901760, %v1137_v26 }
  0x58   :  { %666 = vmatpush.msra.mxu2 %v1494_v11  ;;  %725 = vmatpush.msra.mxu3 %v1077_v43 }
  0x59   :  { %615 = vmatpush.msra.mxu1 %v1060_v31  ;;  %375 = vmatmul.f32.vlgmr.msrb.gmra.mxu0 %v1257_v20  ;;  %v1496_v31 = vand.u32 4294901760, %v1145_v1 }
  0x5a   :  { %572 = vmatpush.msra.mxu0 %v1137_v26  ;;  %670 = vmatpush.msra.mxu2 %v1495_v7  ;;  %v1497_v26 = vand.u32 4294901760, %v1160_v38 }
  0x5b   :  { %617 = vmatpush.msra.mxu1 %v1077_v43  ;;  %727 = vmatpush.msra.mxu3 %v1092_v57  ;;  %v1498_v43 = vand.u32 4294901760, %v1177_v48 }
  0x5c   :  { %412 = vmatmul.f32.vlgmr.msrb.gmra.mxu1 %v1257_v20  ;;  %575 = vmatpush.msra.mxu0 %v1145_v1 }
  0x5d   :  { %619 = vmatpush.msra.mxu1 %v1092_v57  ;;  %674 = vmatpush.msra.mxu2 %v1496_v31 }
  0x5e   :  { %729 = vmatpush.msra.mxu3 %v1108_v2  ;;  %578 = vmatpush.msra.mxu0 %v1160_v38 }
  0x5f   :  { %621 = vmatpush.msra.mxu1 %v1108_v2  ;;  %678 = vmatpush.msra.mxu2 %v1497_v26 }
  0x60   :  { %731 = vmatpush.msra.mxu3 %v1113_v6  ;;  %581 = vmatpush.msra.mxu0 %v1177_v48 }
  0x61   :  { %623 = vmatpush.msra.mxu1 %v1113_v6  ;;  %682 = vmatpush.msra.mxu2 %v1498_v43 }
  0x62   :  { %733 = vmatpush.msra.mxu3 %v1129_v53  ;;  %584 = vmatpush.msra.mxu0 %v1189_v33 }
  0x63   :  { %625 = vmatpush.msra.mxu1 %v1129_v53  ;;  %686 = vmatpush.msra.mxu2 %v507_v56 }
  0x64   :  { %735 = vmatpush.msra.mxu3 %v1152_v23  ;;  %587 = vmatpush.msra.mxu0 %v1201_v60  ;;  %v760_v60 = vlaneseq }
  0x65   :  { %627 = vmatpush.msra.mxu1 %v1152_v23  ;;  %690 = vmatpush.msra.mxu2 %v513_v37 }
  0x66   :  { %737 = vmatpush.msra.mxu3 %v1167_v24  ;;  %590 = vmatpush.msra.mxu0 %v1213_v13  ;;  %v761_v37 = vand.u32 127, %v760_v60 }
  0x67   :  { %629 = vmatpush.msra.mxu1 %v1167_v24  ;;  %694 = vmatpush.msra.mxu2 %v519_v34 }
  0x68   :  { %739 = vmatpush.msra.mxu3 %v1179_v29  ;;  %593 = vmatpush.msra.mxu0 %v1226_v44  ;;  %vm768_vm0 = vcmp.ge.s32.totalorder %v761_v37, 5  ;;  %vm769_vm1 = vcmp.lt.s32.totalorder %v761_v37, 40  ;;  %vm762_vm4 = vcmp.lt.s32.totalorder %v761_v37, 5 }
  0x69   :  { %631 = vmatpush.msra.mxu1 %v1179_v29  ;;  %698 = vmatpush.msra.mxu2 %v525_v27  ;;  %vm770_vm2 = vmand %vm768_vm0, %vm769_vm1 }
  0x6a   :  { %741 = vmatpush.msra.mxu3 %v1191_v51  ;;  %453 = vmatmul.f32.vlgmr.msrb.gmra.mxu2 %v111_v12 }
  0x6b   :  { %554 = vmatmul.f32.vlgmr.msrb.gmra.mxu3 %v1257_v20  ;;  %596 = vmatpush.msra.mxu0 %v1239_v36 }
  0x6c   :  { %633 = vmatpush.msra.mxu1 %v1191_v51  ;;  %702 = vmatpush.msra.mxu2 %v531_v4 }
  0x6d   :  { %743 = vmatpush.msra.mxu3 %v1203_v63  ;;  %599 = vmatpush.msra.mxu0 %v1252_v40 }
  0x6e   :  { %635 = vmatpush.msra.mxu1 %v1203_v63  ;;  %706 = vmatpush.msra.mxu2 %v537_v22 }
  0x6f   :  { %745 = vmatpush.msra.mxu3 %v1215_v55  ;;  %602 = vmatpush.msra.mxu0 %v1265_v0 }
  0x70   :  { %637 = vmatpush.msra.mxu1 %v1215_v55  ;;  %710 = vmatpush.msra.mxu2 %v543_v14 }
  0x71   :  { %747 = vmatpush.msra.mxu3 %v1228_v21  ;;  %605 = vmatpush.msra.mxu0 %v1296_v15 }
  0x72   :  { %639 = vmatpush.msra.mxu1 %v1228_v21  ;;  %714 = vmatpush.msra.mxu2 %v549_v58 }
  0x73   :  { %749 = vmatpush.msra.mxu3 %v1241_v16  ;;  %608 = vmatmul.f32.vlgmr.msra.gmra.mxu0 %v1281_v10 }
  0x74   :  { %716 = vmatmul.f32.vlgmr.msra.gmra.mxu2 %v1257_v20  ;;  %641 = vmatpush.msra.mxu1 %v1241_v16 }
  0x75   :  { %751 = vmatpush.msra.mxu3 %v1275_v5 }
  0x76   :  { %753 = vmatmul.f32.vlgmr.msra.gmra.mxu3 %v1257_v20  ;;  %643 = vmatpush.msra.mxu1 %v1275_v5 }
  0x77   :  { %647 = vmatmul.f32.vlgmr.msra.gmra.mxu1 %v1302_v17 }
  0xca   :  { %v113_v23 = vpop.f32.mrf.mxu0 }
  0xd0   :  { %v214_v24 = vpop.f32.mrf.mxu1 }
  0xd1   :  { %v268_v51 = vpop.f32.mrf.mxu2  ;;  %v215_v29 = vadd.f32 %v214_v24, %v113_v23 }
  0xd3   :  { %v307_v2 = vpop.f32.mrf.mxu3  ;;  %v269_v1 = vadd.f32 %v268_v51, %v215_v29 }
  0xd5   :  { %v308_v48 = vadd.f32 %v307_v2, %v269_v1 }
  0xd6   :  { %v376_v57 = vpop.f32.mrf.mxu0 }
  0xd7   :  { %v377_v63 = vadd.f32 %v376_v57, %v308_v48 }
  0xd9   :  { %v413_v6 = vpop.f32.mrf.mxu1 }
  0xda   :  { %v414_v34 = vadd.f32 %v413_v6, %v377_v63 }
  0xdc   :  { %v757_v40 = vmul.f32 %v414_v34, %v414_v34 }
  0xed   :  { %v454_v53 = vpop.f32.mrf.mxu2 }
  0xee   :  { %v555_v38 = vpop.f32.mrf.mxu3 }
  0xef   :  { %v556_v21 = vadd.f32 %v555_v38, %v454_v53 }
  0xf0   :  { %v609_v33 = vpop.f32.mrf.mxu0 }
  0xf1   :  { %v610_v56 = vadd.f32 %v609_v33, %v556_v21 }
  0xf4   :  { %v648_v13 = vpop.f32.mrf.mxu1 }
  0xf5   :  { %v649_v55 = vadd.f32 %v648_v13, %v610_v56 }
  0xf7   :  { %v717_v44 = vpop.f32.mrf.mxu2 }
  0xf8   :  { %v718_v36 = vadd.f32 %v717_v44, %v649_v55 }
  0xf9   :  { %v754_v16 = vpop.f32.mrf.mxu3 }
  0xfa   :  { %v755_v27 = vadd.f32 %v754_v16, %v718_v36 }
  0xfc   :  { %v758_v20 = vmul.f32 %v755_v27, %v755_v27 }
  0xfe   :  { %v759_v4 = vadd.f32 %v758_v20, %v757_v40 }
 0x100   :  { %v771_v0 = vsel %vm770_vm2, %v759_v4, 0.0  ;;  %v763_v5 = vsel %vm762_vm4, %v759_v4, 0.0 }
 0x101   :  { %v772_v22 = vsel %vm764_vm3, %v771_v0, 0.0  ;;  %v765_v10 = vsel %vm764_vm3, %v763_v5, 0.0 }
 0x102   :  { %773 = vadd.xlane.f32.xlu0 %v772_v22 }
 0x10a   :  { %766 = vadd.xlane.f32.xlu0 %v765_v10 }
 0x175   :  { %v774_v14 = vpop.xlane.xlu0 %773 }
 0x176   :  { %819 = vrcp.f32 %v774_v14  ;;  %v786_v50 = vand.u32 2147483648, %v774_v14  ;;  %v784_v52 = vand.u32 2147483647, %v774_v14  ;;  %vm780_vm6 = vweird.f32 %v774_v14 }
 0x178   :  { %v787_v3 = vor.u32 1.1754944e-38, %v786_v50  ;;  %vm785_vm8 = vcmp.eq.f32.partialorder %v784_v52, 8.507059e+37 }
 0x17c   :  { %v820_v42 = vpop.eup %819 }
 0x17d   :  { %v776_v54 = vmul.f32 %v820_v42, %v774_v14  ;;  %vm781_vm5 = vweird.f32 %v820_v42  ;;  %v767_v28 = vpop.xlane.xlu0 %766 }
 0x17e   :  { %vm782_vm7 = vmor %vm780_vm6, %vm781_vm5 }
 0x17f   :  { %v777_v15 = vsub.f32 1.0, %v776_v54 }
 0x181   :  { %v778_v17 = vmul.f32 %v820_v42, %v777_v15 }
 0x183   :  { %v779_v9 = vadd.f32 %v820_v42, %v778_v17 }
 0x185   :  { %v783_v25 = vsel %vm782_vm7, %v820_v42, %v779_v9 }
 0x186   :  { %v788_v58 = vsel %vm785_vm8, %v787_v3, %v783_v25 }
 0x187   :  { %v789_v18 = vmul.f32 %v788_v58, %v767_v28 }
 0x189   :  { %821 = vlog2.f32 %v789_v18 }
 0x18f   :  { %v822_v32 = vpop.eup %821 }
 0x190   :  { %v791_v61 = vmul.f32 0.6931472, %v822_v32 }
 0x192   :  { %v792_v45 = vmul.f32 0.4342945, %v791_v61 }
 0x194   :  { %v793_v30 = vmul.f32 -10.0, %v792_v45 }
 0x196   :  { %795 = vst.msk [vmem:[#allocation7] sm:$0x1] %vm794_vm9, %v793_v30 }
 0x197   :  { %806 = dma.vmem_to_hbm [thread:$0]  %s802_s1, 16, %s804_s23, [#allocation4]  }
 0x198   :  { %899 = dma.done.wait [#allocation4], 16  }
 0x199   :  { %900 = vsyncadd [#allocation4], 4294967280 }
 0x19a   :  { %811 = vsyncpa [#allocation3], 1 }
 0x19b   :  { %812 = vsyncpa [#allocation6], 1 }
 0x19c   :  { %813 = vsyncpa [#allocation4], 1 }

</bundles_post_ra>
